<compile_context>
chip_gen: v6e
topology: v6e:2x2x1
jax: 0.10.0
libtpu: 0.0.40
codegen_flags: <defaults>
</compile_context>

<pallas_src>
import jax
import jax.numpy as jnp
from jax.experimental import pallas as pl
from jax.experimental.pallas import tpu as pltpu


def fused_linear_kernel(x_ref, w_ref, b_ref, o_ref):
    # Single MXU matmul, f32 accumulation, VPU broadcast bias add.
    y = jnp.dot(x_ref[...], w_ref[...], preferred_element_type=jnp.float32)
    o_ref[...] = (y + b_ref[...].astype(jnp.float32)).astype(o_ref.dtype)


def seq2seq2(x, w1, b1, w2, b2, *, tm_cap=512):
    """y = (x @ w1 + b1) @ w2 + b2, fused into one matmul kernel.

    x:  (B, in_features)
    w1: (in_features, hidden), b1: (1, hidden)
    w2: (hidden, out_features), b2: (1, out_features)
    """
    B, in_f = x.shape
    hidden = w1.shape[1]
    out_f = w2.shape[1]
    # Shape sanity checks (correctness concern from review).
    assert w1.shape == (in_f, hidden), (w1.shape, (in_f, hidden))
    assert b1.shape == (1, hidden), b1.shape
    assert w2.shape == (hidden, out_f), w2.shape
    assert b2.shape == (1, out_f), b2.shape

    # Algebraic fusion (exact: no nonlinearity between the linears).
    # Keep the fold in f32, cast operands only at the end.
    w_eff = jnp.dot(w1.astype(jnp.float32), w2.astype(jnp.float32),
                    preferred_element_type=jnp.float32).astype(x.dtype)
    b_eff = (jnp.dot(b1.astype(jnp.float32), w2.astype(jnp.float32),
                     preferred_element_type=jnp.float32)
             + b2.astype(jnp.float32)).astype(x.dtype)

    # Batch tiling: single full block for small B, >=8-row-aligned tiles
    # (<= tm_cap) with weights resident across the grid for big B.
    tm = B if B <= tm_cap else tm_cap
    grid = (pl.cdiv(B, tm),)

    itemsize = jnp.dtype(x.dtype).itemsize
    cost = pl.CostEstimate(
        flops=2 * B * in_f * out_f,
        transcendentals=0,
        bytes_accessed=(B * in_f + in_f * out_f + out_f + B * out_f) * itemsize,
    )

    return pl.pallas_call(
        fused_linear_kernel,
        out_shape=jax.ShapeDtypeStruct((B, out_f), x.dtype),
        grid_spec=pltpu.PrefetchScalarGridSpec(
            num_scalar_prefetch=0,
            grid=grid,
            in_specs=[
                pl.BlockSpec((tm, in_f), lambda i: (i, 0)),      # x tile
                pl.BlockSpec((in_f, out_f), lambda i: (0, 0)),   # resident W_eff
                pl.BlockSpec((1, out_f), lambda i: (0, 0)),      # resident b_eff
            ],
            out_specs=pl.BlockSpec((tm, out_f), lambda i: (i, 0)),
        ),
        compiler_params=pltpu.CompilerParams(
            dimension_semantics=("parallel",)),
        cost_estimate=cost,
    )(x, w_eff, b_eff)
    # TODO(synk): if this ever sits on a hot path with many such heads, pack
    # several 16-wide outputs along the lane axis (or pad out_f to 128) so the
    # final store is an unmasked, lane-dense vst.


if __name__ == "__main__":
    # Small shapes consistent with the module: input_shape=32, hidden=64, output=16
    batch, in_features, hidden, out_features = 8, 32, 64, 16

    key = jax.random.PRNGKey(0)
    kx, kw1, kb1, kw2, kb2 = jax.random.split(key, 5)

    x = jax.random.normal(kx, (batch, in_features), dtype=jnp.float32)
    # Deterministic parameter init (uniform, nn.Linear-style bounds)
    bound1 = 1.0 / (in_features ** 0.5)
    w1 = jax.random.uniform(kw1, (in_features, hidden), jnp.float32, -bound1, bound1)
    b1 = jax.random.uniform(kb1, (1, hidden), jnp.float32, -bound1, bound1)
    bound2 = 1.0 / (hidden ** 0.5)
    w2 = jax.random.uniform(kw2, (hidden, out_features), jnp.float32, -bound2, bound2)
    b2 = jax.random.uniform(kb2, (1, out_features), jnp.float32, -bound2, bound2)

    out = seq2seq2(x, w1, b1, w2, b2)
    out = jax.block_until_ready(out)

    # Reference (plain JAX, unfused two-linear form) check
    ref = (x @ w1 + b1) @ w2 + b2
    assert out.shape == (batch, out_features)
    assert jnp.allclose(out, ref, atol=1e-5, rtol=1e-4), "mismatch vs reference"

    print("KERNEL_OK")
</pallas_src>

<mosaic_0001>
module attributes {stable_mosaic.version = 11 : i64} {
  func.func @fused_linear_kernel(%arg0: i32, %arg1: memref<8x32xf32, #tpu.memory_space<vmem>>, %arg2: memref<32x16xf32, #tpu.memory_space<vmem>>, %arg3: memref<1x16xf32, #tpu.memory_space<vmem>>, %arg4: memref<8x16xf32, #tpu.memory_space<vmem>>) attributes {dimension_semantics = [#tpu.dimension_semantics<parallel>], iteration_bounds = array<i64: 1>, scalar_prefetch = 0 : i64, scratch_operands = 0 : i64, tpu.core_type = #tpu.core_type<tc>, window_params = [{transform_indices = @transform_0, window_bounds = array<i64: 8, 32>}, {pipeline_mode = #tpu.pipeline_mode<synchronous>, transform_indices = @transform_1, window_bounds = array<i64: 32, 16>}, {pipeline_mode = #tpu.pipeline_mode<synchronous>, transform_indices = @transform_2, window_bounds = array<i64: 1, 16>}, {transform_indices = @transform_3, window_bounds = array<i64: 8, 16>}]} {
    %c0 = arith.constant 0 : index
    %c0_0 = arith.constant 0 : index
    %0 = vector.load %arg1[%c0, %c0_0] : memref<8x32xf32, #tpu.memory_space<vmem>>, vector<8x32xf32>
    %c0_1 = arith.constant 0 : index
    %c0_2 = arith.constant 0 : index
    %1 = vector.load %arg2[%c0_1, %c0_2] : memref<32x16xf32, #tpu.memory_space<vmem>>, vector<32x16xf32>
    %cst = arith.constant dense<0.000000e+00> : vector<8x16xf32>
    %2 = tpu.matmul %0, %1, %cst {dimension_numbers = #tpu.dot_dimension_numbers<[1], [0], [0], [1], [0, 0, 1, 1], [], []>} : vector<8x32xf32>, vector<32x16xf32>, vector<8x16xf32> -> vector<8x16xf32>
    %c0_3 = arith.constant 0 : index
    %c0_4 = arith.constant 0 : index
    %3 = vector.load %arg3[%c0_3, %c0_4] : memref<1x16xf32, #tpu.memory_space<vmem>>, vector<1x16xf32>
    %4 = vector.broadcast %3 : vector<1x16xf32> to vector<8x16xf32>
    %5 = arith.addf %2, %4 : vector<8x16xf32>
    %c0_5 = arith.constant 0 : index
    %c0_6 = arith.constant 0 : index
    %6 = vector.load %arg4[%c0_5, %c0_6] : memref<8x16xf32, #tpu.memory_space<vmem>>, vector<8x16xf32>
    tpu.vector_store %arg4[%c0_5, %c0_6], %5 {strides = array<i32>} : memref<8x16xf32, #tpu.memory_space<vmem>>, vector<8x16xf32>,
    return
  }
  func.func @transform_0(%arg0: i32) -> (i32, i32) {
    %c0_i32 = arith.constant 0 : i32
    %c0_i32_0 = arith.constant 0 : i32
    return %arg0, %c0_i32 : i32, i32
  }
  func.func @transform_1(%arg0: i32) -> (i32, i32) {
    %c0_i32 = arith.constant 0 : i32
    %c0_i32_0 = arith.constant 0 : i32
    %c0_i32_1 = arith.constant 0 : i32
    return %c0_i32, %c0_i32_0 : i32, i32
  }
  func.func @transform_2(%arg0: i32) -> (i32, i32) {
    %c0_i32 = arith.constant 0 : i32
    %c0_i32_0 = arith.constant 0 : i32
    %c0_i32_1 = arith.constant 0 : i32
    return %c0_i32, %c0_i32_0 : i32, i32
  }
  func.func @transform_3(%arg0: i32) -> (i32, i32) {
    %c0_i32 = arith.constant 0 : i32
    %c0_i32_0 = arith.constant 0 : i32
    return %arg0, %c0_i32 : i32, i32
  }
}

</mosaic_0001>

<bundles_post_ra>
// kernel: tpu_custom_call.1
= control target key start
LH: loop header
LB: loop body
LE: loop exit
PB: predicated region body
PF: predicated region fallthrough
CT: control target
= control target key end

     0   :  { %v160_v1 = vmov 0.0   ;;  %vm161_vm0 = vmmov 0   ;;  %s204_s0 = inlined_call_operand.vmem [shape: f32[8,32], index: 0, kind: input, shape index: {}]   ;;  %s205_s1 = inlined_call_operand.vmem [shape: f32[32,16], index: 1, kind: input, shape index: {}]   ;;  %s206_s2 = inlined_call_operand.vmem [shape: f32[1,16], index: 2, kind: input, shape index: {}]   ;;  %s207_s3 = inlined_call_operand.hbm [shape: f32[8,16], index: 3, kind: output, shape index: {}]  }
   0x1   :  { %v19_v0 = vld [vmem:[%s205_s1 + $0x18] sm:$0xff]  ;;  %124 = vmatprep.subr.mxu0 %v160_v1  ;;  %v18_v2 = vld [vmem:[%s205_s1 + $0x10] sm:$0xff]  ;;  %132 = vmatprep.mubr.msk.f32.mxu0 %vm161_vm0, %v160_v1 }
   0x2   :  { %125 = vmatpush3.msra.mxu0 %v19_v0 }
   0x3   :  { %8 = vsyncpa [#allocation3], 0  ;;  %126 = vmatprep.subr.mxu0 %v160_v1  ;;  %v17_v3 = vld [vmem:[%s205_s1 + $0x8] sm:$0xff]  ;;  %v16_v4 = vld [vmem:[%s205_s1] sm:$0xff]  ;;  %vm27_vm1 = vcmask 261120   ;;  %s162_s24 = smov [#allocation2]  }
   0x4   :  { %127 = vmatpush3.msra.mxu0 %v18_v2  ;;  %v15_v5 = vld [vmem:[%s204_s0] sm:$0xff]  ;;  %s109_s25 = sshll.u32 %s162_s24, 4  ;;  %vm101_vm2 = vcmask 130048   ;;  %s110_s25 = int_to_ptr.vmem [resolvable:$true] %s109_s25 }
   0x5   :  { %128 = vmatprep.subr.mxu0 %v160_v1  ;;  %v117_v6 = vld [vmem:[%s206_s2] ss:$0 sm:$0xff]  ;;  %s138_s1 = scalar_lea.vmem %s110_s25, 128  ;;  %p143_p1 = scmp.lt.s32.totalorder %s110_s25, %s110_s25 }
   0x6   :  { %129 = vmatpush3.msra.mxu0 %v17_v3  ;;  %p139_p0 = scmp.ne.s32.totalorder %s110_s25, %s138_s1  ;;  %p144_p2 = scmp.lt.s32.totalorder %s138_s1, %s138_s1 }
   0x7   :  { %130 = vmatprep.subr.mxu0 %v160_v1 }
   0x8   :  { %131 = vmatpush3.msra.mxu0 %v16_v4  ;;  %p145_p3 = por %p144_p2, %p143_p1 }
   0x9   :  { %133 = vmatmul.mubr.msk.f32.vlgmr.msra.gmra.mxu0 %vm27_vm1, %v15_v5 }
   0xa   :  { %p146_p4 = pnand %p145_p3, %p139_p0 }
  0xc9   :  { %v97_v7 = vpop.f32.mrf.mxu0 }
  0xca   :  { %v98_v8 = vadd.f32 %v117_v6, %v97_v7 }
  0xcb   :  { %v134_v9 = vpop.f32.mrf.mxu0 }
  0xcc   :  { %102 = vst.msk [vmem:[#allocation2] sm:$0xff] %vm101_vm2, %v98_v8 }
  0xcd   :  { %149 = shalt.err (!%p146_p4)
}
  0xce   :  { %112 = dma.vmem_to_hbm [thread:$0]  %s110_s25, 128, %s207_s3, [#allocation3]  }
  0xcf   :  { %158 = dma.done.wait [#allocation3], 128  }
  0xd0   :  { %159 = vsyncadd [#allocation3], 4294967168 }
  0xd1   :  { %116 = vsyncpa [#allocation3], 1 }

</bundles_post_ra>
